<compile_context>
chip_gen: v7x
topology: tpu7x:2x2x1
jax: 0.10.0
libtpu: 0.0.40
codegen_flags: <defaults>
</compile_context>

<pallas_src>
import math

import jax
import jax.numpy as jnp
from jax.experimental import pallas as pl
from jax.experimental.pallas import tpu as pltpu


# ---------------------------------------------------------------------------
# Fused MHA kernel: one grid step == `block_b` batch elements, all heads.
# ---------------------------------------------------------------------------

def _make_fused_mha_kernel(h, d_k, block_b, seq, d_model, has_mask):
    M = block_b * seq  # flattened token count per grid step

    def kernel(*refs):
        if has_mask:
            (xq_ref, xk_ref, xv_ref, mask_ref,
             wq_ref, bq_ref, wk_ref, bk_ref, wv_ref, bv_ref, wo_ref, bo_ref,
             o_ref, ctx_ref) = refs
        else:
            (xq_ref, xk_ref, xv_ref,
             wq_ref, bq_ref, wk_ref, bk_ref, wv_ref, bv_ref, wo_ref, bo_ref,
             o_ref, ctx_ref) = refs

        # --- Q/K/V projections on flattened (block_b*S, D) activations.
        # bf16 at the MXU inputs only; accumulation / elementwise stays f32.
        xq = xq_ref[...].reshape(M, d_model).astype(jnp.bfloat16)
        xk = xk_ref[...].reshape(M, d_model).astype(jnp.bfloat16)
        xv = xv_ref[...].reshape(M, d_model).astype(jnp.bfloat16)

        # 1/sqrt(d_k) is already folded into wq/bq host-side.
        q = jnp.dot(xq, wq_ref[...], preferred_element_type=jnp.float32) + bq_ref[...]
        k = jnp.dot(xk, wk_ref[...], preferred_element_type=jnp.float32) + bk_ref[...]
        v = jnp.dot(xv, wv_ref[...], preferred_element_type=jnp.float32) + bv_ref[...]

        # Leading-dim split back to (block_b, S, D); cast MXU operands once.
        qb = q.reshape(block_b, seq, d_model).astype(jnp.bfloat16)
        kb = k.reshape(block_b, seq, d_model).astype(jnp.bfloat16)
        vb = v.reshape(block_b, seq, d_model).astype(jnp.bfloat16)

        if has_mask:
            add_mask = mask_ref[...].astype(jnp.float32)   # (block_b, S, S)

        # --- per-head attention; context written straight into its lane slice
        #     of the f32 scratch (no concatenate; per-head temps die here).
        for head in range(h):
            lo = head * d_k
            hi = lo + d_k
            q_h = qb[:, :, lo:hi]                # (block_b, S, d_k) static slice
            k_h = kb[:, :, lo:hi]
            v_h = vb[:, :, lo:hi]

            scores = jnp.einsum("bqd,bkd->bqk", q_h, k_h,
                                preferred_element_type=jnp.float32)
            if has_mask:
                scores = scores + add_mask       # additive mask: single vadd

            # numerically stable softmax in f32; reciprocal on the EUP slot
            s_max = jnp.max(scores, axis=-1, keepdims=True)
            e = jnp.exp(scores - s_max)
            denom = jnp.sum(e, axis=-1, keepdims=True)
            p = e * pl.reciprocal(denom, approx=True)

            ctx_ref[:, :, lo:hi] = jnp.einsum(
                "bqk,bkd->bqd", p.astype(jnp.bfloat16), v_h,
                preferred_element_type=jnp.float32)

        # --- output projection on the lane-dense (M, D) context ---
        ctx = ctx_ref[...].reshape(M, d_model).astype(jnp.bfloat16)
        out = jnp.dot(ctx, wo_ref[...], preferred_element_type=jnp.float32) + bo_ref[...]
        o_ref[...] = out.reshape(block_b, seq, d_model).astype(o_ref.dtype)

    return kernel


# ---------------------------------------------------------------------------
# Python wrapper: one pallas_call for the whole forward pass
# ---------------------------------------------------------------------------

def multi_headed_attention(query, key, value, params, h, mask=None, block_b=None):
    """params = ((wq, bq), (wk, bk), (wv, bv), (wo, bo)); weights stored
    (d_in, d_out) so y = x @ W + b (== PyTorch x @ W_pt.T + b)."""
    B, S, D = query.shape
    d_k = D // h
    (wq, bq), (wk, bk), (wv, bv), (wo, bo) = params

    # Fold 1/sqrt(d_k) into Wq/bq (host-side, amortized), weights -> bf16.
    scale = 1.0 / math.sqrt(d_k)
    wq_b = (wq * scale).astype(jnp.bfloat16)
    bq_s = (bq * scale).astype(jnp.float32)
    wk_b = wk.astype(jnp.bfloat16)
    wv_b = wv.astype(jnp.bfloat16)
    wo_b = wo.astype(jnp.bfloat16)
    bk_s = bk.astype(jnp.float32)
    bv_s = bv.astype(jnp.float32)
    bo_s = bo.astype(jnp.float32)

    # Batch blocking: keep >= 2 grid steps when possible (v7x has 2 TCs);
    # each step still flattens block_b*S tokens for the projection matmuls.
    if block_b is None:
        block_b = B // 2 if (B >= 2 and B % 2 == 0) else 1
    assert B % block_b == 0, "block_b must divide batch"
    grid = (B // block_b,)

    has_mask = mask is not None
    kernel = _make_fused_mha_kernel(h, d_k, block_b, S, D, has_mask)

    act_spec = pl.BlockSpec((block_b, S, D), lambda i: (i, 0, 0))
    w_spec = pl.BlockSpec((D, D), lambda i: (0, 0))
    b_spec = pl.BlockSpec((1, D), lambda i: (0, 0))
    out_spec = pl.BlockSpec((block_b, S, D), lambda i: (i, 0, 0))

    inputs = [query, key, value]
    in_specs = [act_spec, act_spec, act_spec]
    if has_mask:
        # Compact additive mask (bf16, 0 / -1e9); half the DMA of f32.
        add_mask = jnp.where(mask == 0, -1000000000.0, 0.0).astype(jnp.bfloat16)
        inputs.append(add_mask)
        in_specs.append(pl.BlockSpec((block_b, S, S), lambda i: (i, 0, 0)))

    inputs += [wq_b, bq_s, wk_b, bk_s, wv_b, bv_s, wo_b, bo_s]
    in_specs += [w_spec, b_spec, w_spec, b_spec, w_spec, b_spec, w_spec, b_spec]

    out = pl.pallas_call(
        kernel,
        out_shape=jax.ShapeDtypeStruct((B, S, D), query.dtype),
        grid=grid,
        in_specs=in_specs,
        out_specs=out_spec,
        scratch_shapes=[pltpu.VMEM((block_b, S, D), jnp.float32)],
        compiler_params=pltpu.CompilerParams(
            dimension_semantics=("parallel",)),
    )(*inputs)
    return out


# ---------------------------------------------------------------------------
# Pure-JAX reference (for correctness check only)
# ---------------------------------------------------------------------------

def reference_mha(query, key, value, params, h, mask=None):
    B, S, D = query.shape
    d_k = D // h
    (wq, bq), (wk, bk), (wv, bv), (wo, bo) = params

    def proj(x, w, b):
        y = x.reshape(B * S, D) @ w + b
        return y.reshape(B, S, h, d_k).transpose(0, 2, 1, 3)

    q, k, v = proj(query, wq, bq), proj(key, wk, bk), proj(value, wv, bv)
    scores = jnp.einsum("bhqd,bhkd->bhqk", q, k) / math.sqrt(d_k)
    if mask is not None:
        scores = jnp.where(mask[:, None, :, :] == 0, -1000000000.0, scores)
    p = jax.nn.softmax(scores, axis=-1)
    x = jnp.einsum("bhqk,bhkd->bhqd", p, v)
    x = x.transpose(0, 2, 1, 3).reshape(B * S, D)
    return (x @ wo + bo).reshape(B, S, D)


# ---------------------------------------------------------------------------
# Main
# ---------------------------------------------------------------------------

if __name__ == "__main__":
    B, S, D, H = 2, 8, 32, 4

    key_rng = jax.random.PRNGKey(0)
    keys = jax.random.split(key_rng, 12)

    query = jax.random.normal(keys[0], (B, S, D), jnp.float32)
    key_in = jax.random.normal(keys[1], (B, S, D), jnp.float32)
    value = jax.random.normal(keys[2], (B, S, D), jnp.float32)

    # Deterministic parameter init (shapes from nn.Linear(d_model, d_model) x 4)
    def make_linear(kw, kb):
        w = jax.random.normal(kw, (D, D), jnp.float32) * 0.1   # stored (d_in, d_out)
        b = jax.random.normal(kb, (1, D), jnp.float32) * 0.01
        return (w, b)

    params = (
        make_linear(keys[3], keys[4]),   # W_q, b_q
        make_linear(keys[5], keys[6]),   # W_k, b_k
        make_linear(keys[7], keys[8]),   # W_v, b_v
        make_linear(keys[9], keys[10]),  # W_o, b_o
    )

    # Causal mask, shape (B, S, S); forward broadcasts it over heads.
    causal = jnp.tril(jnp.ones((S, S), jnp.float32))
    mask = jnp.broadcast_to(causal, (B, S, S))

    # Masked path
    out = multi_headed_attention(query, key_in, value, params, H, mask=mask)
    out = jax.block_until_ready(out)
    ref = reference_mha(query, key_in, value, params, H, mask=mask)
    assert out.shape == (B, S, D)
    # Tolerance accounts for bf16 MXU operands + EUP approximate reciprocal;
    # the f32 reference is the exact semantics of the PyTorch module.
    assert jnp.allclose(out, ref, rtol=2e-2, atol=2e-2), "mismatch vs reference (masked)"

    # Unmasked path (exercises the mask-skipping kernel variant)
    out_nm = multi_headed_attention(query, key_in, value, params, H, mask=None)
    out_nm = jax.block_until_ready(out_nm)
    ref_nm = reference_mha(query, key_in, value, params, H, mask=None)
    assert jnp.allclose(out_nm, ref_nm, rtol=2e-2, atol=2e-2), "mismatch vs reference (no mask)"

    print("KERNEL_OK")
</pallas_src>

<mosaic_0001>
module attributes {stable_mosaic.version = 11 : i64} {
  func.func @kernel(%arg0: i32, %arg1: memref<1x8x32xf32, #tpu.memory_space<vmem>>, %arg2: memref<1x8x32xf32, #tpu.memory_space<vmem>>, %arg3: memref<1x8x32xf32, #tpu.memory_space<vmem>>, %arg4: memref<1x8x8xbf16, #tpu.memory_space<vmem>>, %arg5: memref<32x32xbf16, #tpu.memory_space<vmem>>, %arg6: memref<1x32xf32, #tpu.memory_space<vmem>>, %arg7: memref<32x32xbf16, #tpu.memory_space<vmem>>, %arg8: memref<1x32xf32, #tpu.memory_space<vmem>>, %arg9: memref<32x32xbf16, #tpu.memory_space<vmem>>, %arg10: memref<1x32xf32, #tpu.memory_space<vmem>>, %arg11: memref<32x32xbf16, #tpu.memory_space<vmem>>, %arg12: memref<1x32xf32, #tpu.memory_space<vmem>>, %arg13: memref<1x8x32xf32, #tpu.memory_space<vmem>>, %arg14: memref<1x8x32xf32, #tpu.memory_space<vmem>>) attributes {dimension_semantics = [#tpu.dimension_semantics<parallel>], iteration_bounds = array<i64: 2>, scalar_prefetch = 0 : i64, scratch_operands = 1 : i64, tpu.core_type = #tpu.core_type<tc>, window_params = [{transform_indices = @transform_0, window_bounds = array<i64: 1, 8, 32>}, {transform_indices = @transform_1, window_bounds = array<i64: 1, 8, 32>}, {transform_indices = @transform_2, window_bounds = array<i64: 1, 8, 32>}, {transform_indices = @transform_3, window_bounds = array<i64: 1, 8, 8>}, {pipeline_mode = #tpu.pipeline_mode<synchronous>, transform_indices = @transform_4, window_bounds = array<i64: 32, 32>}, {pipeline_mode = #tpu.pipeline_mode<synchronous>, transform_indices = @transform_5, window_bounds = array<i64: 1, 32>}, {pipeline_mode = #tpu.pipeline_mode<synchronous>, transform_indices = @transform_6, window_bounds = array<i64: 32, 32>}, {pipeline_mode = #tpu.pipeline_mode<synchronous>, transform_indices = @transform_7, window_bounds = array<i64: 1, 32>}, {pipeline_mode = #tpu.pipeline_mode<synchronous>, transform_indices = @transform_8, window_bounds = array<i64: 32, 32>}, {pipeline_mode = #tpu.pipeline_mode<synchronous>, transform_indices = @transform_9, window_bounds = array<i64: 1, 32>}, {pipeline_mode = #tpu.pipeline_mode<synchronous>, transform_indices = @transform_10, window_bounds = array<i64: 32, 32>}, {pipeline_mode = #tpu.pipeline_mode<synchronous>, transform_indices = @transform_11, window_bounds = array<i64: 1, 32>}, {transform_indices = @transform_12, window_bounds = array<i64: 1, 8, 32>}]} {
    %c0 = arith.constant 0 : index
    %c0_0 = arith.constant 0 : index
    %c0_1 = arith.constant 0 : index
    %0 = vector.load %arg1[%c0, %c0_0, %c0_1] : memref<1x8x32xf32, #tpu.memory_space<vmem>>, vector<1x8x32xf32>
    %1 = vector.shape_cast %0 : vector<1x8x32xf32> to vector<8x32xf32>
    %2 = arith.truncf %1 : vector<8x32xf32> to vector<8x32xbf16>
    %c0_2 = arith.constant 0 : index
    %c0_3 = arith.constant 0 : index
    %c0_4 = arith.constant 0 : index
    %3 = vector.load %arg2[%c0_2, %c0_3, %c0_4] : memref<1x8x32xf32, #tpu.memory_space<vmem>>, vector<1x8x32xf32>
    %4 = vector.shape_cast %3 : vector<1x8x32xf32> to vector<8x32xf32>
    %5 = arith.truncf %4 : vector<8x32xf32> to vector<8x32xbf16>
    %c0_5 = arith.constant 0 : index
    %c0_6 = arith.constant 0 : index
    %c0_7 = arith.constant 0 : index
    %6 = vector.load %arg3[%c0_5, %c0_6, %c0_7] : memref<1x8x32xf32, #tpu.memory_space<vmem>>, vector<1x8x32xf32>
    %7 = vector.shape_cast %6 : vector<1x8x32xf32> to vector<8x32xf32>
    %8 = arith.truncf %7 : vector<8x32xf32> to vector<8x32xbf16>
    %c0_8 = arith.constant 0 : index
    %c0_9 = arith.constant 0 : index
    %9 = vector.load %arg5[%c0_8, %c0_9] : memref<32x32xbf16, #tpu.memory_space<vmem>>, vector<32x32xbf16>
    %cst = arith.constant dense<0.000000e+00> : vector<8x32xf32>
    %10 = tpu.matmul %2, %9, %cst {dimension_numbers = #tpu.dot_dimension_numbers<[1], [0], [0], [1], [0, 0, 1, 1], [], []>} : vector<8x32xbf16>, vector<32x32xbf16>, vector<8x32xf32> -> vector<8x32xf32>
    %c0_10 = arith.constant 0 : index
    %c0_11 = arith.constant 0 : index
    %11 = vector.load %arg6[%c0_10, %c0_11] : memref<1x32xf32, #tpu.memory_space<vmem>>, vector<1x32xf32>
    %12 = vector.broadcast %11 : vector<1x32xf32> to vector<8x32xf32>
    %13 = arith.addf %10, %12 : vector<8x32xf32>
    %c0_12 = arith.constant 0 : index
    %c0_13 = arith.constant 0 : index
    %14 = vector.load %arg7[%c0_12, %c0_13] : memref<32x32xbf16, #tpu.memory_space<vmem>>, vector<32x32xbf16>
    %cst_14 = arith.constant dense<0.000000e+00> : vector<8x32xf32>
    %15 = tpu.matmul %5, %14, %cst_14 {dimension_numbers = #tpu.dot_dimension_numbers<[1], [0], [0], [1], [0, 0, 1, 1], [], []>} : vector<8x32xbf16>, vector<32x32xbf16>, vector<8x32xf32> -> vector<8x32xf32>
    %c0_15 = arith.constant 0 : index
    %c0_16 = arith.constant 0 : index
    %16 = vector.load %arg8[%c0_15, %c0_16] : memref<1x32xf32, #tpu.memory_space<vmem>>, vector<1x32xf32>
    %17 = vector.broadcast %16 : vector<1x32xf32> to vector<8x32xf32>
    %18 = arith.addf %15, %17 : vector<8x32xf32>
    %c0_17 = arith.constant 0 : index
    %c0_18 = arith.constant 0 : index
    %19 = vector.load %arg9[%c0_17, %c0_18] : memref<32x32xbf16, #tpu.memory_space<vmem>>, vector<32x32xbf16>
    %cst_19 = arith.constant dense<0.000000e+00> : vector<8x32xf32>
    %20 = tpu.matmul %8, %19, %cst_19 {dimension_numbers = #tpu.dot_dimension_numbers<[1], [0], [0], [1], [0, 0, 1, 1], [], []>} : vector<8x32xbf16>, vector<32x32xbf16>, vector<8x32xf32> -> vector<8x32xf32>
    %c0_20 = arith.constant 0 : index
    %c0_21 = arith.constant 0 : index
    %21 = vector.load %arg10[%c0_20, %c0_21] : memref<1x32xf32, #tpu.memory_space<vmem>>, vector<1x32xf32>
    %22 = vector.broadcast %21 : vector<1x32xf32> to vector<8x32xf32>
    %23 = arith.addf %20, %22 : vector<8x32xf32>
    %24 = vector.shape_cast %13 : vector<8x32xf32> to vector<1x8x32xf32>
    %25 = arith.truncf %24 : vector<1x8x32xf32> to vector<1x8x32xbf16>
    %26 = vector.shape_cast %18 : vector<8x32xf32> to vector<1x8x32xf32>
    %27 = arith.truncf %26 : vector<1x8x32xf32> to vector<1x8x32xbf16>
    %28 = vector.shape_cast %23 : vector<8x32xf32> to vector<1x8x32xf32>
    %29 = arith.truncf %28 : vector<1x8x32xf32> to vector<1x8x32xbf16>
    %c0_22 = arith.constant 0 : index
    %c0_23 = arith.constant 0 : index
    %c0_24 = arith.constant 0 : index
    %30 = vector.load %arg4[%c0_22, %c0_23, %c0_24] : memref<1x8x8xbf16, #tpu.memory_space<vmem>>, vector<1x8x8xbf16>
    %31 = arith.extf %30 : vector<1x8x8xbf16> to vector<1x8x8xf32>
    %32 = vector.extract_strided_slice %25 {offsets = [0, 0, 0], sizes = [1, 8, 8], strides = [1, 1, 1]} : vector<1x8x32xbf16> to vector<1x8x8xbf16>
    %33 = vector.extract_strided_slice %27 {offsets = [0, 0, 0], sizes = [1, 8, 8], strides = [1, 1, 1]} : vector<1x8x32xbf16> to vector<1x8x8xbf16>
    %34 = vector.extract_strided_slice %29 {offsets = [0, 0, 0], sizes = [1, 8, 8], strides = [1, 1, 1]} : vector<1x8x32xbf16> to vector<1x8x8xbf16>
    "tpu.trace_start"() <{level = 10 : i32, message = "bqd,bkd->bqk"}> : () -> ()
    %cst_25 = arith.constant dense<0.000000e+00> : vector<1x8x8xf32>
    %35 = tpu.matmul %32, %33, %cst_25 {dimension_numbers = #tpu.dot_dimension_numbers<[2], [2], [1], [1], [0, 0, 0, 1, 1, 1], [0], [0]>} : vector<1x8x8xbf16>, vector<1x8x8xbf16>, vector<1x8x8xf32> -> vector<1x8x8xf32>
    "tpu.trace_stop"() : () -> ()
    %36 = arith.addf %35, %31 : vector<1x8x8xf32>
    %cst_26 = arith.constant dense<0xFF800000> : vector<1x8xf32>
    %37 = vector.multi_reduction <maximumf>, %36, %cst_26 [2] : vector<1x8x8xf32> to vector<1x8xf32>
    %38 = vector.shape_cast %37 : vector<1x8xf32> to vector<1x8x1xf32>
    %39 = vector.broadcast %38 : vector<1x8x1xf32> to vector<1x8x8xf32>
    %40 = arith.subf %36, %39 : vector<1x8x8xf32>
    %41 = math.exp %40 : vector<1x8x8xf32>
    %cst_27 = arith.constant dense<0.000000e+00> : vector<1x8xf32>
    %42 = vector.multi_reduction <add>, %41, %cst_27 [2] : vector<1x8x8xf32> to vector<1x8xf32>
    %43 = vector.shape_cast %42 : vector<1x8xf32> to vector<1x8x1xf32>
    %44 = tpu.reciprocal %43 {approx = true} : vector<1x8x1xf32> -> vector<1x8x1xf32>
    %45 = vector.broadcast %44 : vector<1x8x1xf32> to vector<1x8x8xf32>
    %46 = arith.mulf %41, %45 : vector<1x8x8xf32>
    %47 = arith.truncf %46 : vector<1x8x8xf32> to vector<1x8x8xbf16>
    "tpu.trace_start"() <{level = 10 : i32, message = "bqk,bkd->bqd"}> : () -> ()
    %cst_28 = arith.constant dense<0.000000e+00> : vector<1x8x8xf32>
    %48 = tpu.matmul %47, %34, %cst_28 {dimension_numbers = #tpu.dot_dimension_numbers<[2], [1], [1], [2], [0, 0, 0, 1, 1, 2], [0], [0]>} : vector<1x8x8xbf16>, vector<1x8x8xbf16>, vector<1x8x8xf32> -> vector<1x8x8xf32>
    "tpu.trace_stop"() : () -> ()
    %c0_29 = arith.constant 0 : index
    %c0_30 = arith.constant 0 : index
    %c0_31 = arith.constant 0 : index
    %49 = vector.load %arg14[%c0_29, %c0_30, %c0_31] : memref<1x8x32xf32, #tpu.memory_space<vmem>>, vector<1x8x8xf32>
    tpu.vector_store %arg14[%c0_29, %c0_30, %c0_31], %48 {strides = array<i32>} : memref<1x8x32xf32, #tpu.memory_space<vmem>>, vector<1x8x8xf32>,
    %50 = vector.extract_strided_slice %25 {offsets = [0, 0, 8], sizes = [1, 8, 8], strides = [1, 1, 1]} : vector<1x8x32xbf16> to vector<1x8x8xbf16>
    %51 = vector.extract_strided_slice %27 {offsets = [0, 0, 8], sizes = [1, 8, 8], strides = [1, 1, 1]} : vector<1x8x32xbf16> to vector<1x8x8xbf16>
    %52 = vector.extract_strided_slice %29 {offsets = [0, 0, 8], sizes = [1, 8, 8], strides = [1, 1, 1]} : vector<1x8x32xbf16> to vector<1x8x8xbf16>
    "tpu.trace_start"() <{level = 10 : i32, message = "bqd,bkd->bqk"}> : () -> ()
    %cst_32 = arith.constant dense<0.000000e+00> : vector<1x8x8xf32>
    %53 = tpu.matmul %50, %51, %cst_32 {dimension_numbers = #tpu.dot_dimension_numbers<[2], [2], [1], [1], [0, 0, 0, 1, 1, 1], [0], [0]>} : vector<1x8x8xbf16>, vector<1x8x8xbf16>, vector<1x8x8xf32> -> vector<1x8x8xf32>
    "tpu.trace_stop"() : () -> ()
    %54 = arith.addf %53, %31 : vector<1x8x8xf32>
    %cst_33 = arith.constant dense<0xFF800000> : vector<1x8xf32>
    %55 = vector.multi_reduction <maximumf>, %54, %cst_33 [2] : vector<1x8x8xf32> to vector<1x8xf32>
    %56 = vector.shape_cast %55 : vector<1x8xf32> to vector<1x8x1xf32>
    %57 = vector.broadcast %56 : vector<1x8x1xf32> to vector<1x8x8xf32>
    %58 = arith.subf %54, %57 : vector<1x8x8xf32>
    %59 = math.exp %58 : vector<1x8x8xf32>
    %cst_34 = arith.constant dense<0.000000e+00> : vector<1x8xf32>
    %60 = vector.multi_reduction <add>, %59, %cst_34 [2] : vector<1x8x8xf32> to vector<1x8xf32>
    %61 = vector.shape_cast %60 : vector<1x8xf32> to vector<1x8x1xf32>
    %62 = tpu.reciprocal %61 {approx = true} : vector<1x8x1xf32> -> vector<1x8x1xf32>
    %63 = vector.broadcast %62 : vector<1x8x1xf32> to vector<1x8x8xf32>
    %64 = arith.mulf %59, %63 : vector<1x8x8xf32>
    %65 = arith.truncf %64 : vector<1x8x8xf32> to vector<1x8x8xbf16>
    "tpu.trace_start"() <{level = 10 : i32, message = "bqk,bkd->bqd"}> : () -> ()
    %cst_35 = arith.constant dense<0.000000e+00> : vector<1x8x8xf32>
    %66 = tpu.matmul %65, %52, %cst_35 {dimension_numbers = #tpu.dot_dimension_numbers<[2], [1], [1], [2], [0, 0, 0, 1, 1, 2], [0], [0]>} : vector<1x8x8xbf16>, vector<1x8x8xbf16>, vector<1x8x8xf32> -> vector<1x8x8xf32>
    "tpu.trace_stop"() : () -> ()
    %c0_36 = arith.constant 0 : index
    %c0_37 = arith.constant 0 : index
    %c8 = arith.constant 8 : index
    %67 = vector.load %arg14[%c0_36, %c0_37, %c8] : memref<1x8x32xf32, #tpu.memory_space<vmem>>, vector<1x8x8xf32>
    tpu.vector_store %arg14[%c0_36, %c0_37, %c8], %66 {strides = array<i32>} : memref<1x8x32xf32, #tpu.memory_space<vmem>>, vector<1x8x8xf32>,
    %68 = vector.extract_strided_slice %25 {offsets = [0, 0, 16], sizes = [1, 8, 8], strides = [1, 1, 1]} : vector<1x8x32xbf16> to vector<1x8x8xbf16>
    %69 = vector.extract_strided_slice %27 {offsets = [0, 0, 16], sizes = [1, 8, 8], strides = [1, 1, 1]} : vector<1x8x32xbf16> to vector<1x8x8xbf16>
    %70 = vector.extract_strided_slice %29 {offsets = [0, 0, 16], sizes = [1, 8, 8], strides = [1, 1, 1]} : vector<1x8x32xbf16> to vector<1x8x8xbf16>
    "tpu.trace_start"() <{level = 10 : i32, message = "bqd,bkd->bqk"}> : () -> ()
    %cst_38 = arith.constant dense<0.000000e+00> : vector<1x8x8xf32>
    %71 = tpu.matmul %68, %69, %cst_38 {dimension_numbers = #tpu.dot_dimension_numbers<[2], [2], [1], [1], [0, 0, 0, 1, 1, 1], [0], [0]>} : vector<1x8x8xbf16>, vector<1x8x8xbf16>, vector<1x8x8xf32> -> vector<1x8x8xf32>
    "tpu.trace_stop"() : () -> ()
    %72 = arith.addf %71, %31 : vector<1x8x8xf32>
    %cst_39 = arith.constant dense<0xFF800000> : vector<1x8xf32>
    %73 = vector.multi_reduction <maximumf>, %72, %cst_39 [2] : vector<1x8x8xf32> to vector<1x8xf32>
    %74 = vector.shape_cast %73 : vector<1x8xf32> to vector<1x8x1xf32>
    %75 = vector.broadcast %74 : vector<1x8x1xf32> to vector<1x8x8xf32>
    %76 = arith.subf %72, %75 : vector<1x8x8xf32>
    %77 = math.exp %76 : vector<1x8x8xf32>
    %cst_40 = arith.constant dense<0.000000e+00> : vector<1x8xf32>
    %78 = vector.multi_reduction <add>, %77, %cst_40 [2] : vector<1x8x8xf32> to vector<1x8xf32>
    %79 = vector.shape_cast %78 : vector<1x8xf32> to vector<1x8x1xf32>
    %80 = tpu.reciprocal %79 {approx = true} : vector<1x8x1xf32> -> vector<1x8x1xf32>
    %81 = vector.broadcast %80 : vector<1x8x1xf32> to vector<1x8x8xf32>
    %82 = arith.mulf %77, %81 : vector<1x8x8xf32>
    %83 = arith.truncf %82 : vector<1x8x8xf32> to vector<1x8x8xbf16>
    "tpu.trace_start"() <{level = 10 : i32, message = "bqk,bkd->bqd"}> : () -> ()
    %cst_41 = arith.constant dense<0.000000e+00> : vector<1x8x8xf32>
    %84 = tpu.matmul %83, %70, %cst_41 {dimension_numbers = #tpu.dot_dimension_numbers<[2], [1], [1], [2], [0, 0, 0, 1, 1, 2], [0], [0]>} : vector<1x8x8xbf16>, vector<1x8x8xbf16>, vector<1x8x8xf32> -> vector<1x8x8xf32>
    "tpu.trace_stop"() : () -> ()
    %c0_42 = arith.constant 0 : index
    %c0_43 = arith.constant 0 : index
    %c16 = arith.constant 16 : index
    %85 = vector.load %arg14[%c0_42, %c0_43, %c16] : memref<1x8x32xf32, #tpu.memory_space<vmem>>, vector<1x8x8xf32>
    tpu.vector_store %arg14[%c0_42, %c0_43, %c16], %84 {strides = array<i32>} : memref<1x8x32xf32, #tpu.memory_space<vmem>>, vector<1x8x8xf32>,
    %86 = vector.extract_strided_slice %25 {offsets = [0, 0, 24], sizes = [1, 8, 8], strides = [1, 1, 1]} : vector<1x8x32xbf16> to vector<1x8x8xbf16>
    %87 = vector.extract_strided_slice %27 {offsets = [0, 0, 24], sizes = [1, 8, 8], strides = [1, 1, 1]} : vector<1x8x32xbf16> to vector<1x8x8xbf16>
    %88 = vector.extract_strided_slice %29 {offsets = [0, 0, 24], sizes = [1, 8, 8], strides = [1, 1, 1]} : vector<1x8x32xbf16> to vector<1x8x8xbf16>
    "tpu.trace_start"() <{level = 10 : i32, message = "bqd,bkd->bqk"}> : () -> ()
    %cst_44 = arith.constant dense<0.000000e+00> : vector<1x8x8xf32>
    %89 = tpu.matmul %86, %87, %cst_44 {dimension_numbers = #tpu.dot_dimension_numbers<[2], [2], [1], [1], [0, 0, 0, 1, 1, 1], [0], [0]>} : vector<1x8x8xbf16>, vector<1x8x8xbf16>, vector<1x8x8xf32> -> vector<1x8x8xf32>
    "tpu.trace_stop"() : () -> ()
    %90 = arith.addf %89, %31 : vector<1x8x8xf32>
    %cst_45 = arith.constant dense<0xFF800000> : vector<1x8xf32>
    %91 = vector.multi_reduction <maximumf>, %90, %cst_45 [2] : vector<1x8x8xf32> to vector<1x8xf32>
    %92 = vector.shape_cast %91 : vector<1x8xf32> to vector<1x8x1xf32>
    %93 = vector.broadcast %92 : vector<1x8x1xf32> to vector<1x8x8xf32>
    %94 = arith.subf %90, %93 : vector<1x8x8xf32>
    %95 = math.exp %94 : vector<1x8x8xf32>
    %cst_46 = arith.constant dense<0.000000e+00> : vector<1x8xf32>
    %96 = vector.multi_reduction <add>, %95, %cst_46 [2] : vector<1x8x8xf32> to vector<1x8xf32>
    %97 = vector.shape_cast %96 : vector<1x8xf32> to vector<1x8x1xf32>
    %98 = tpu.reciprocal %97 {approx = true} : vector<1x8x1xf32> -> vector<1x8x1xf32>
    %99 = vector.broadcast %98 : vector<1x8x1xf32> to vector<1x8x8xf32>
    %100 = arith.mulf %95, %99 : vector<1x8x8xf32>
    %101 = arith.truncf %100 : vector<1x8x8xf32> to vector<1x8x8xbf16>
    "tpu.trace_start"() <{level = 10 : i32, message = "bqk,bkd->bqd"}> : () -> ()
    %cst_47 = arith.constant dense<0.000000e+00> : vector<1x8x8xf32>
    %102 = tpu.matmul %101, %88, %cst_47 {dimension_numbers = #tpu.dot_dimension_numbers<[2], [1], [1], [2], [0, 0, 0, 1, 1, 2], [0], [0]>} : vector<1x8x8xbf16>, vector<1x8x8xbf16>, vector<1x8x8xf32> -> vector<1x8x8xf32>
    "tpu.trace_stop"() : () -> ()
    %c0_48 = arith.constant 0 : index
    %c0_49 = arith.constant 0 : index
    %c24 = arith.constant 24 : index
    %103 = vector.load %arg14[%c0_48, %c0_49, %c24] : memref<1x8x32xf32, #tpu.memory_space<vmem>>, vector<1x8x8xf32>
    tpu.vector_store %arg14[%c0_48, %c0_49, %c24], %102 {strides = array<i32>} : memref<1x8x32xf32, #tpu.memory_space<vmem>>, vector<1x8x8xf32>,
    %c0_50 = arith.constant 0 : index
    %c0_51 = arith.constant 0 : index
    %c0_52 = arith.constant 0 : index
    %104 = vector.load %arg14[%c0_50, %c0_51, %c0_52] : memref<1x8x32xf32, #tpu.memory_space<vmem>>, vector<1x8x32xf32>
    %105 = vector.shape_cast %104 : vector<1x8x32xf32> to vector<8x32xf32>
    %106 = arith.truncf %105 : vector<8x32xf32> to vector<8x32xbf16>
    %c0_53 = arith.constant 0 : index
    %c0_54 = arith.constant 0 : index
    %107 = vector.load %arg11[%c0_53, %c0_54] : memref<32x32xbf16, #tpu.memory_space<vmem>>, vector<32x32xbf16>
    %cst_55 = arith.constant dense<0.000000e+00> : vector<8x32xf32>
    %108 = tpu.matmul %106, %107, %cst_55 {dimension_numbers = #tpu.dot_dimension_numbers<[1], [0], [0], [1], [0, 0, 1, 1], [], []>} : vector<8x32xbf16>, vector<32x32xbf16>, vector<8x32xf32> -> vector<8x32xf32>
    %c0_56 = arith.constant 0 : index
    %c0_57 = arith.constant 0 : index
    %109 = vector.load %arg12[%c0_56, %c0_57] : memref<1x32xf32, #tpu.memory_space<vmem>>, vector<1x32xf32>
    %110 = vector.broadcast %109 : vector<1x32xf32> to vector<8x32xf32>
    %111 = arith.addf %108, %110 : vector<8x32xf32>
    %112 = vector.shape_cast %111 : vector<8x32xf32> to vector<1x8x32xf32>
    %c0_58 = arith.constant 0 : index
    %c0_59 = arith.constant 0 : index
    %c0_60 = arith.constant 0 : index
    %113 = vector.load %arg13[%c0_58, %c0_59, %c0_60] : memref<1x8x32xf32, #tpu.memory_space<vmem>>, vector<1x8x32xf32>
    tpu.vector_store %arg13[%c0_58, %c0_59, %c0_60], %112 {strides = array<i32>} : memref<1x8x32xf32, #tpu.memory_space<vmem>>, vector<1x8x32xf32>,
    return
  }
  func.func @transform_0(%arg0: i32) -> (i32, i32, i32) {
    %c0_i32 = arith.constant 0 : i32
    %c0_i32_0 = arith.constant 0 : i32
    %c0_i32_1 = arith.constant 0 : i32
    return %arg0, %c0_i32, %c0_i32_0 : i32, i32, i32
  }
  func.func @transform_1(%arg0: i32) -> (i32, i32, i32) {
    %c0_i32 = arith.constant 0 : i32
    %c0_i32_0 = arith.constant 0 : i32
    %c0_i32_1 = arith.constant 0 : i32
    return %arg0, %c0_i32, %c0_i32_0 : i32, i32, i32
  }
  func.func @transform_2(%arg0: i32) -> (i32, i32, i32) {
    %c0_i32 = arith.constant 0 : i32
    %c0_i32_0 = arith.constant 0 : i32
    %c0_i32_1 = arith.constant 0 : i32
    return %arg0, %c0_i32, %c0_i32_0 : i32, i32, i32
  }
  func.func @transform_3(%arg0: i32) -> (i32, i32, i32) {
    %c0_i32 = arith.constant 0 : i32
    %c0_i32_0 = arith.constant 0 : i32
    %c0_i32_1 = arith.constant 0 : i32
    return %arg0, %c0_i32, %c0_i32_0 : i32, i32, i32
  }
  func.func @transform_4(%arg0: i32) -> (i32, i32) {
    %c0_i32 = arith.constant 0 : i32
    %c0_i32_0 = arith.constant 0 : i32
    %c0_i32_1 = arith.constant 0 : i32
    return %c0_i32, %c0_i32_0 : i32, i32
  }
  func.func @transform_5(%arg0: i32) -> (i32, i32) {
    %c0_i32 = arith.constant 0 : i32
    %c0_i32_0 = arith.constant 0 : i32
    %c0_i32_1 = arith.constant 0 : i32
    return %c0_i32, %c0_i32_0 : i32, i32
  }
  func.func @transform_6(%arg0: i32) -> (i32, i32) {
    %c0_i32 = arith.constant 0 : i32
    %c0_i32_0 = arith.constant 0 : i32
    %c0_i32_1 = arith.constant 0 : i32
    return %c0_i32, %c0_i32_0 : i32, i32
  }
  func.func @transform_7(%arg0: i32) -> (i32, i32) {
    %c0_i32 = arith.constant 0 : i32
    %c0_i32_0 = arith.constant 0 : i32
    %c0_i32_1 = arith.constant 0 : i32
    return %c0_i32, %c0_i32_0 : i32, i32
  }
  func.func @transform_8(%arg0: i32) -> (i32, i32) {
    %c0_i32 = arith.constant 0 : i32
    %c0_i32_0 = arith.constant 0 : i32
    %c0_i32_1 = arith.constant 0 : i32
    return %c0_i32, %c0_i32_0 : i32, i32
  }
  func.func @transform_9(%arg0: i32) -> (i32, i32) {
    %c0_i32 = arith.constant 0 : i32
    %c0_i32_0 = arith.constant 0 : i32
    %c0_i32_1 = arith.constant 0 : i32
    return %c0_i32, %c0_i32_0 : i32, i32
  }
  func.func @transform_10(%arg0: i32) -> (i32, i32) {
    %c0_i32 = arith.constant 0 : i32
    %c0_i32_0 = arith.constant 0 : i32
    %c0_i32_1 = arith.constant 0 : i32
    return %c0_i32, %c0_i32_0 : i32, i32
  }
  func.func @transform_11(%arg0: i32) -> (i32, i32) {
    %c0_i32 = arith.constant 0 : i32
    %c0_i32_0 = arith.constant 0 : i32
    %c0_i32_1 = arith.constant 0 : i32
    return %c0_i32, %c0_i32_0 : i32, i32
  }
  func.func @transform_12(%arg0: i32) -> (i32, i32, i32) {
    %c0_i32 = arith.constant 0 : i32
    %c0_i32_0 = arith.constant 0 : i32
    %c0_i32_1 = arith.constant 0 : i32
    return %arg0, %c0_i32, %c0_i32_0 : i32, i32, i32
  }
}

</mosaic_0001>

<bundles_post_ra>
// kernel: tpu_custom_call.1
= control target key start
LH: loop header
LB: loop body
LE: loop exit
PB: predicated region body
PF: predicated region fallthrough
CT: control target
= control target key end

     0   :  { %s2619_s0 = inlined_call_operand.hbm [shape: f32[2,8,32], index: 0, kind: input, shape index: {}]   ;;  %s2620_s1 = inlined_call_operand.hbm [shape: f32[2,8,32], index: 1, kind: input, shape index: {}]   ;;  %s2621_s2 = inlined_call_operand.hbm [shape: f32[2,8,32], index: 2, kind: input, shape index: {}]   ;;  %s2622_s3 = inlined_call_operand.hbm [shape: bf16[2,8,8], index: 3, kind: input, shape index: {}]   ;;  %s2623_s4 = inlined_call_operand.hbm [shape: bf16[32,32], index: 4, kind: input, shape index: {}]   ;;  %s2624_s5 = inlined_call_operand.vmem [shape: f32[1,32], index: 5, kind: input, shape index: {}]   ;;  %s2625_s6 = inlined_call_operand.vmem [shape: bf16[32,32], index: 6, kind: input, shape index: {}]   ;;  %s2626_s7 = inlined_call_operand.vmem [shape: f32[1,32], index: 7, kind: input, shape index: {}]   ;;  %s2627_s8 = inlined_call_operand.hbm [shape: bf16[32,32], index: 8, kind: input, shape index: {}]   ;;  %s2628_s9 = inlined_call_operand.hbm [shape: f32[1,32], index: 9, kind: input, shape index: {}]   ;;  %s2629_s10 = inlined_call_operand.vmem [shape: bf16[32,32], index: 10, kind: input, shape index: {}]   ;;  %s2630_s11 = inlined_call_operand.vmem [shape: f32[1,32], index: 11, kind: input, shape index: {}]   ;;  %s2631_s12 = inlined_call_operand.hbm [shape: f32[2,8,32], index: 12, kind: output, shape index: {}]  }
   0x1   :  { %2651 = sst [smem:[#allocation28_spill]] %s2620_s1 }
   0x2   :  { %2652 = sst [smem:[#allocation29_spill]] %s2623_s4 }
   0x3   :  { %2653 = sst [smem:[#allocation30_spill]] %s2627_s8 }
   0x4   :  { %2654 = sst [smem:[#allocation31_spill]] %s2629_s10 }
   0x5   :  { %2655 = sst [smem:[#allocation32_spill]] %s2630_s11 }
   0x6   :  { %2656 = sst [smem:[#allocation33_spill]] %s2631_s12 }
   0x7   :  { %17 = vsyncpa [#allocation4], 0 }
   0x8   :  { %19 = vsyncpa [#allocation4 + $0x1], 0 }
   0x9   :  { %20 = vsyncpa [#allocation7], 0 }
   0xa   :  { %22 = vsyncpa [#allocation7 + $0x1], 0 }
   0xb   :  { %23 = vsyncpa [#allocation10], 0 }
   0xc   :  { %25 = vsyncpa [#allocation10 + $0x1], 0 }
   0xd   :  { %26 = vsyncpa [#allocation13], 0 }
   0xe   :  { %27 = vsyncpa [#allocation5], 0 }
   0xf   :  { %29 = vsyncpa [#allocation5 + $0x1], 0  ;;  %s2150_s21 = smov 0   ;;  %s2152_s22 = smov 0  }
  0x10   :  { %s2154_s23 = smov 0   ;;  %s2156_s24 = smov 0  }
  0x11 LB: > { %2657 = sst [smem:[#allocation22_spill]] %s2053_s21  ;;  %s2171_s25 = sadd.s32 4294967295, %s2065_s24   ;;  %s2065_s24 = sphi %s2156_s24, %s2697_s24   ;;  %s2061_s23 = sphi %s2154_s23, %s2699_s23   ;;  %s2057_s22 = sphi %s2152_s22, %s2701_s22   ;;  %s2053_s21 = sphi %s2150_s21, %s2700_s21  }
  0x12   : > { %2658 = sst [smem:[#allocation23_spill]] %s2061_s23  ;;  %s1494_s26 = sadd.s32 4294967294, %s2065_s24  }
  0x13   : > { %p55_p0 = scmp.ne.s32.totalorder %s2057_s22, %s2053_s21  ;;  %p2633_p1 = scmp.eq.s32.totalorder %s2171_s25, 0 }
  0x14   : > { %p331_p3 = scmp.eq.s32.totalorder %s1494_s26, 1  ;;  %p1495_p5 = scmp.ge.s32.totalorder %s2065_s24, 1 }
  0x15   : > { %p2180_p4 = por %p2633_p1, %p55_p0  ;;  %p338_p7 = scmp.lt.s32.totalorder %s2065_s24, 3 }
  0x16   : > { %p2185_p6 = por %p331_p3, %p55_p0  ;;  %s2067_s30 = smov [#allocation11]  }
  0x17   : > { %s2659_s27 = scalar_select %p2180_p4, 1, 0 }
  0x18   : > { %s2660_s28 = scalar_select %p2185_p6, 1, 0 }
  0x19   : > { %p2190_p8 = pnand %p1495_p5, %p338_p7  ;;  %s350_s13 = sshll.u32 %s2067_s30, 4  ;;  %s2194_s13 = int_to_ptr.vmem [resolvable:$true] %s350_s13 }
  0x1a   : > { %2661 = sst [smem:[#allocation24_spill]] %s2660_s28  ;;  %s2068_s15 = smov [#allocation12]  }
  0x1b   : > { %s2662_s29 = scalar_select %p2190_p8, 1, 0 }
  0x1c   : > { %p1675_p9 = pneg %p2190_p8  ;;  %s372_s16 = sshll.u32 %s2068_s15, 4  ;;  %s2205_s16 = int_to_ptr.vmem [resolvable:$true] %s372_s16 }
  0x1d   : > { %s2664_s4 = sld [smem:[#allocation29_spill]] }
  0x1e   : > { %p2201_p11 = pnand %p1675_p9, %p2633_p1 }
  0x20   : > { %s2663_s14 = scalar_select %p2201_p11, 1, 0 }
  0x21   : > { %p2215_p13 = pneg %p2201_p11 }
  0x23   : > { %s1779_s19 = scalar_lea.hbm %s2664_s4, 256 }
  0x24   : > { %p1780_p12 = scmp.ne.s32.totalorder %s2664_s4, %s1779_s19  ;;  %p1786_p5 = scmp.lt.u32.totalorder %s1779_s19, %s2664_s4 }
  0x25   : > { %s2665_s30 = scalar_select %p2215_p13, 1, 0 }
  0x26   : > { %p1782_p0 = pnand %p2215_p13, %p1780_p12 }
  0x28   : > { %p1783_p3 = pneg %p1782_p0 }
  0x2a   : > { %p1788_p7 = pnand %p1786_p5, %p1783_p3 }
  0x2c   : > { %1791 = shalt.err (!%p1788_p7)
}
  0x2d   : > { %s1792_s17 = scalar_lea.vmem %s2194_s13, 256  ;;  %p1800_p2 = scmp.lt.s32.totalorder %s2194_s13, %s2194_s13 }
  0x2e   : > { %p1793_p9 = scmp.ne.s32.totalorder %s2194_s13, %s1792_s17  ;;  %p1801_p6 = scmp.lt.s32.totalorder %s1792_s17, %s1792_s17 }
  0x30   : > { %p1795_p10 = pnand %p1793_p9, %p2215_p13  ;;  %p1802_p12 = por %p1801_p6, %p1800_p2 }
  0x32   : > { %p1796_p1 = pneg %p1795_p10 }
  0x34   : > { %p1803_p0 = pnand %p1802_p12, %p1796_p1 }
  0x36   : > { %1806 = shalt.err (!%p1803_p0)
}
  0x37   : > { %s2069_s18 = smov 64   ;;  %s2070_s28 = smov 4  }
  0x38   : > { %1678 = dma.hbm_to_vmem [thread:$0]  (!%p2201_p11), %s2664_s4, 256, %s2194_s13, [#allocation10], %s2069_s18, %s2069_s18, %s2070_s28  }
  0x39   : > { %s2666_s8 = sld [smem:[#allocation30_spill]] }
  0x3f   : > { %s1807_s21 = scalar_lea.hbm %s2666_s8, 256 }
  0x40   : > { %p1808_p2 = scmp.ne.s32.totalorder %s2666_s8, %s1807_s21  ;;  %p1814_p10 = scmp.lt.u32.totalorder %s1807_s21, %s2666_s8 }
  0x42   : > { %p1810_p1 = pnand %p1808_p2, %p2215_p13 }
  0x44   : > { %p1811_p6 = pneg %p1810_p1 }
  0x46   : > { %p1816_p3 = pnand %p1814_p10, %p1811_p6 }
  0x48   : > { %1819 = shalt.err (!%p1816_p3)
}
  0x49   : > { %s1820_s13 = scalar_lea.vmem %s2205_s16, 256  ;;  %p1828_p12 = scmp.lt.s32.totalorder %s2205_s16, %s2205_s16 }
  0x4a   : > { %p1821_p5 = scmp.ne.s32.totalorder %s2205_s16, %s1820_s13  ;;  %p1829_p0 = scmp.lt.s32.totalorder %s1820_s13, %s1820_s13 }
  0x4c   : > { %p1823_p7 = pnand %p1821_p5, %p2215_p13  ;;  %p1830_p2 = por %p1829_p0, %p1828_p12 }
  0x4e   : > { %p1824_p9 = pneg %p1823_p7 }
  0x50   : > { %p1831_p1 = pnand %p1830_p2, %p1824_p9 }
  0x52   : > { %1834 = shalt.err (!%p1831_p1)
}
  0x53   : > { %1681 = dma.hbm_to_vmem [thread:$0]  (!%p2201_p11), %s2666_s8, 256, %s2205_s16, [#allocation13], %s2069_s18, %s2069_s18, %s2070_s28  }
  0x54   : > { %s2260_s12 = sadd.s32 1, %s2065_s24   ;;  %s42_s21 = sadd.s32 1, %s2061_s23 }
  0x55   : > { %2667 = sst [smem:[#allocation25_spill]] %s2260_s12  ;;  %s39_s19 = ssub.s32 %s2065_s24, %s2260_s12 }
  0x56   : > { %p49_p6 = scmp.ne.s32.totalorder %s2061_s23, %s2057_s22  ;;  %p40_p10 = scmp.eq.s32.totalorder %s39_s19, 0 }
  0x57   : > { %p50_p3 = scmp.eq.s32.totalorder %s2065_s24, 0  ;;  %p2668_p5 = scmp.eq.s32.totalorder %s2171_s25, 1 }
  0x58   : > { %p1705_p9 = scmp.lt.s32.totalorder %s2065_s24, 2  ;;  %s2279_s15 = sand.u32 1, %s2061_s23  }
  0x59   : > { %p2270_p7 = por %p2668_p5, %p49_p6  ;;  %p51_p12 = por %p50_p3, %p49_p6 }
  0x5a   : > { %s2276_s26 = scalar_select %p40_p10, %s2061_s23, %s42_s21  }
  0x5b   : > { %s2669_s20 = scalar_select %p2270_p7, 1, 0 }
  0x5c   : > { %2671 = sst [smem:[#allocation27_spill]] %s2276_s26  ;;  %s2282_s16 = sshll.u32 %s2279_s15, 3 }
  0x5d   : > { %2670 = sst [smem:[#allocation26_spill]] %s2669_s20  ;;  %s2285_s18 = sshll.u32 %s2065_s24, 7 }
  0x5e   : > { %p2287_p0 = pnand %p1705_p9, %p51_p12  ;;  %s2642_s17 = sand.u32 1, %s2065_s24  }
  0x5f   : > { %s2673_s1 = sld [smem:[#allocation28_spill]]  ;;  %s425_s21 = scalar_lea.vmem [#allocation6], %s2282_s16 }
  0x60   : > { %s2672_s28 = scalar_select %p2287_p0, 1, 0 }
  0x61   : > { %s432_s19 = sshll.u32 %s425_s21, 4  ;;  %s2303_s4 = scalar_lea.sflag [#allocation7], %s2642_s17  ;;  %s2299_s19 = int_to_ptr.vmem [resolvable:$true] %s432_s19 }
  0x62   : > { %p2309_p1 = pneg %p2287_p0 }
  0x65   : > { %s2296_s11 = scalar_lea.hbm %s2673_s1, %s2285_s18  ;;  %s1840_s21 = scalar_lea.hbm %s2673_s1, 256 }
  0x66   : > { %s1835_s8 = scalar_lea.hbm %s2296_s11, 128  ;;  %p1841_p3 = scmp.lt.u32.totalorder %s2296_s11, %s2673_s1 }
  0x67   : > { %p1836_p2 = scmp.ne.s32.totalorder %s2296_s11, %s1835_s8  ;;  %p1842_p5 = scmp.lt.u32.totalorder %s1840_s21, %s1835_s8 }
  0x68   : > { %p1844_p12 = scmp.lt.u32.totalorder %s1835_s8, %s2296_s11 }
  0x69   : > { %p1838_p6 = pnand %p2309_p1, %p1836_p2  ;;  %p1843_p9 = por %p1842_p5, %p1841_p3 }
  0x6b   : > { %p1839_p10 = pneg %p1838_p6  ;;  %p1845_p7 = por %p1844_p12, %p1843_p9 }
  0x6d   : > { %p1846_p4 = pnand %p1845_p7, %p1839_p10 }
  0x6f   : > { %1849 = shalt.err (!%p1846_p4)
}
  0x70   : > { %s1850_s17 = scalar_lea.vmem %s2299_s19, 128  ;;  %s2071_s13 = smov [#allocation6]  }
  0x71   : > { %p1851_p2 = scmp.ne.s32.totalorder %s2299_s19, %s1850_s17  ;;  %s1855_s10 = sshll.u32 %s2071_s13, 4  ;;  %s1856_s10 = int_to_ptr.vmem [resolvable:$false] %s1855_s10 }
  0x72   : > { %s1857_s23 = scalar_lea.vmem %s1856_s10, 256  ;;  %p1858_p11 = scmp.lt.s32.totalorder %s2299_s19, %s1856_s10 }
  0x73   : > { %p1853_p6 = pnand %p1851_p2, %p2309_p1  ;;  %p1859_p13 = scmp.lt.s32.totalorder %s1857_s23, %s1850_s17 }
  0x75   : > { %p1854_p8 = pneg %p1853_p6  ;;  %p1860_p3 = por %p1859_p13, %p1858_p11 }
  0x77   : > { %p1861_p5 = pnand %p1860_p3, %p1854_p8 }
  0x79   : > { %1864 = shalt.err (!%p1861_p5)
}
  0x7a   : > { %1691 = dma.hbm_to_vmem [thread:$0]  (!%p2287_p0), %s2296_s11, 128, %s2299_s19, %s2303_s4  }
  0x7b   : > { %s2072_s8 = smov [#allocation14]   ;;  %s1865_s13 = scalar_lea.hbm %s2628_s9, 16 }
  0x7c   : > { %s386_s12 = sshll.u32 %s2072_s8, 4  ;;  %p1866_p4 = scmp.ne.s32.totalorder %s2628_s9, %s1865_s13  ;;  %s387_s12 = int_to_ptr.vmem [resolvable:$true] %s386_s12 }
  0x7d   : > { %p2675_p8 = scmp.ne.s32.totalorder %s2665_s30, 0  ;;  %p1872_p7 = scmp.lt.u32.totalorder %s1865_s13, %s2628_s9 }
  0x7f   : > { %p1868_p11 = pnand %p1866_p4, %p2675_p8 }
  0x81   : > { %p1869_p13 = pneg %p1868_p11 }
  0x83   : > { %p1874_p10 = pnand %p1872_p7, %p1869_p13 }
  0x85   : > { %1877 = shalt.err (!%p1874_p10)
}
  0x86   : > { %s1878_s11 = scalar_lea.vmem %s387_s12, 16  ;;  %s1885_s1 = scalar_lea.vmem %s387_s12, 32 }
  0x87   : > { %p1879_p9 = scmp.ne.s32.totalorder %s387_s12, %s1878_s11  ;;  %p1886_p6 = scmp.lt.s32.totalorder %s387_s12, %s387_s12 }
  0x88   : > { %p1887_p3 = scmp.lt.s32.totalorder %s1885_s1, %s1878_s11 }
  0x89   : > { %p1881_p12 = pnand %p1879_p9, %p2675_p8 }
  0x8a   : > { %p1888_p5 = por %p1887_p3, %p1886_p6 }
  0x8b   : > { %p1882_p2 = pneg %p1881_p12 }
  0x8d   : > { %p1889_p0 = pnand %p1888_p5, %p1882_p2 }
  0x8f   : > { %1892 = shalt.err (!%p1889_p0)
}
  0x90   : > { %p2676_p4 = scmp.ne.s32.totalorder %s2663_s14, 0  ;;  %s2355_s21 = scalar_lea.hbm %s2619_s0, %s2285_s18 }
  0x91   : > { %s407_s13 = scalar_lea.vmem [#allocation3], %s2282_s16  ;;  %s404_s14 = scalar_lea.sflag [#allocation4], %s2279_s15 }
  0x92   : > { %1684 = dma.hbm_to_vmem [thread:$0]  (!%p2676_p4), %s2628_s9, 16, %s387_s12, [#allocation13]  }
  0x93   : > { %s414_s10 = sshll.u32 %s407_s13, 4  ;;  %s1893_s17 = scalar_lea.hbm %s2355_s21, 128  ;;  %s415_s10 = int_to_ptr.vmem [resolvable:$true] %s414_s10 }
  0x94   : > { %p1894_p0 = scmp.ne.s32.totalorder %s2355_s21, %s1893_s17  ;;  %s1898_s11 = scalar_lea.hbm %s2619_s0, 256 }
  0x95   : > { %p1899_p13 = scmp.lt.u32.totalorder %s2355_s21, %s2619_s0  ;;  %p1900_p7 = scmp.lt.u32.totalorder %s1898_s11, %s1893_s17 }
  0x96   : > { %p1896_p8 = pnand %p1894_p0, %p2309_p1  ;;  %p1902_p9 = scmp.lt.u32.totalorder %s1893_s17, %s2355_s21 }
  0x97   : > { %p1901_p10 = por %p1900_p7, %p1899_p13 }
  0x98   : > { %p1897_p11 = pneg %p1896_p8 }
  0x99   : > { %p1903_p12 = por %p1902_p9, %p1901_p10 }
  0x9b   : > { %p1904_p2 = pnand %p1903_p12, %p1897_p11 }
  0x9d   : > { %1907 = shalt.err (!%p1904_p2)
}
  0x9e   : > { %s1908_s19 = scalar_lea.vmem %s415_s10, 128  ;;  %s2073_s8 = smov [#allocation3]  }
  0x9f   : > { %p1909_p6 = scmp.ne.s32.totalorder %s415_s10, %s1908_s19  ;;  %s1913_s30 = sshll.u32 %s2073_s8, 4  ;;  %s1914_s30 = int_to_ptr.vmem [resolvable:$false] %s1913_s30 }
  0xa0   : > { %s1915_s13 = scalar_lea.vmem %s1914_s30, 256  ;;  %p1916_p4 = scmp.lt.s32.totalorder %s415_s10, %s1914_s30 }
  0xa1   : > { %p1911_p3 = pnand %p1909_p6, %p2309_p1  ;;  %p1917_p0 = scmp.lt.s32.totalorder %s1915_s13, %s1908_s19 }
  0xa3   : > { %p1912_p5 = pneg %p1911_p3  ;;  %p1918_p8 = por %p1917_p0, %p1916_p4 }
  0xa5   : > { %p1919_p7 = pnand %p1918_p8, %p1912_p5 }
  0xa7   : > { %1922 = shalt.err (!%p1919_p7)
}
  0xa8   : > { %p2677_p13 = scmp.ne.s32.totalorder %s2672_s28, 0  ;;  %s2380_s12 = scalar_lea.hbm %s2621_s2, %s2285_s18 }
  0xa9   : > { %s443_s11 = scalar_lea.vmem [#allocation8], %s2282_s16  ;;  %s1506_s20 = sshll.u32 %s2279_s15, 2 }
  0xaa   : > { %1688 = dma.hbm_to_vmem [thread:$0]  (!%p2677_p13), %s2355_s21, 128, %s415_s10, %s404_s14  }
  0xab   : > { %s450_s1 = sshll.u32 %s443_s11, 4  ;;  %s1923_s19 = scalar_lea.hbm %s2380_s12, 128  ;;  %s451_s1 = int_to_ptr.vmem [resolvable:$true] %s450_s1 }
  0xac   : > { %p1924_p11 = scmp.ne.s32.totalorder %s2380_s12, %s1923_s19  ;;  %s1928_s10 = scalar_lea.hbm %s2621_s2, 256 }
  0xad   : > { %p1929_p12 = scmp.lt.u32.totalorder %s2380_s12, %s2621_s2  ;;  %p1930_p2 = scmp.lt.u32.totalorder %s1928_s10, %s1923_s19 }
  0xae   : > { %p1926_p10 = pnand %p1924_p11, %p2309_p1  ;;  %p1932_p3 = scmp.lt.u32.totalorder %s1923_s19, %s2380_s12 }
  0xaf   : > { %p1931_p6 = por %p1930_p2, %p1929_p12 }
  0xb0   : > { %p1927_p9 = pneg %p1926_p10 }
  0xb1   : > { %p1933_p5 = por %p1932_p3, %p1931_p6 }
  0xb3   : > { %p1934_p4 = pnand %p1933_p5, %p1927_p9 }
  0xb5   : > { %1937 = shalt.err (!%p1934_p4)
}
  0xb6   : > { %s1938_s16 = scalar_lea.vmem %s451_s1, 128  ;;  %s2074_s30 = smov [#allocation8]  }
  0xb7   : > { %p1939_p0 = scmp.ne.s32.totalorder %s451_s1, %s1938_s16  ;;  %s1943_s13 = sshll.u32 %s2074_s30, 4  ;;  %s1944_s13 = int_to_ptr.vmem [resolvable:$false] %s1943_s13 }
  0xb8   : > { %s1945_s17 = scalar_lea.vmem %s1944_s13, 256  ;;  %p1946_p11 = scmp.lt.s32.totalorder %s451_s1, %s1944_s13 }
  0xb9   : > { %p1941_p8 = pnand %p1939_p0, %p2309_p1  ;;  %p1947_p10 = scmp.lt.s32.totalorder %s1945_s17, %s1938_s16 }
  0xbb   : > { %p1942_p7 = pneg %p1941_p8  ;;  %p1948_p13 = por %p1947_p10, %p1946_p11 }
  0xbd   : > { %p1949_p2 = pnand %p1948_p13, %p1942_p7 }
  0xbf   : > { %1952 = shalt.err (!%p1949_p2)
}
  0xc0   : > { %p2678_p12 = scmp.ne.s32.totalorder %s2672_s28, 0  ;;  %s1507_s23 = sshll.u32 %s2065_s24, 6 }
  0xc1   : > { %s2406_s8 = scalar_lea.hbm %s2622_s3, %s1507_s23  ;;  %s461_s21 = scalar_lea.vmem [#allocation9], %s1506_s20 }
  0xc2   : > { %1694 = dma.hbm_to_vmem [thread:$0]  (!%p2678_p12), %s2380_s12, 128, %s451_s1, %s2303_s4  }
  0xc3   : > { %s468_s10 = sshll.u32 %s461_s21, 4  ;;  %s2679_s14 = sand.u32 1, %s2065_s24   ;;  %s469_s10 = int_to_ptr.vmem [resolvable:$true] %s468_s10 }
  0xc4   : > { %s458_s18 = scalar_lea.sflag [#allocation10], %s2679_s14  ;;  %s1953_s16 = scalar_lea.hbm %s2406_s8, 64 }
  0xc5   : > { %p1954_p13 = scmp.ne.s32.totalorder %s2406_s8, %s1953_s16  ;;  %s1958_s1 = scalar_lea.hbm %s2622_s3, 128 }
  0xc6   : > { %p1959_p3 = scmp.lt.u32.totalorder %s2406_s8, %s2622_s3  ;;  %p1960_p5 = scmp.lt.u32.totalorder %s1958_s1, %s1953_s16 }
  0xc7   : > { %p1956_p9 = pnand %p1954_p13, %p2309_p1  ;;  %p1962_p0 = scmp.lt.u32.totalorder %s1953_s16, %s2406_s8 }
  0xc8   : > { %p1961_p4 = por %p1960_p5, %p1959_p3 }
  0xc9   : > { %p1957_p6 = pneg %p1956_p9 }
  0xca   : > { %p1963_p8 = por %p1962_p0, %p1961_p4 }
  0xcc   : > { %p1964_p7 = pnand %p1963_p8, %p1957_p6 }
  0xce   : > { %1967 = shalt.err (!%p1964_p7)
}
  0xcf   : > { %s1968_s20 = scalar_lea.vmem %s469_s10, 64  ;;  %s2075_s13 = smov [#allocation9]  }
  0xd0   : > { %p1969_p11 = scmp.ne.s32.totalorder %s469_s10, %s1968_s20  ;;  %s1973_s17 = sshll.u32 %s2075_s13, 4  ;;  %s1974_s17 = int_to_ptr.vmem [resolvable:$false] %s1973_s17 }
  0xd1   : > { %s1975_s23 = scalar_lea.vmem %s1974_s17, 128  ;;  %p1976_p13 = scmp.lt.s32.totalorder %s469_s10, %s1974_s17 }
  0xd2   : > { %p1971_p10 = pnand %p1969_p11, %p2309_p1  ;;  %p1977_p9 = scmp.lt.s32.totalorder %s1975_s23, %s1968_s20 }
  0xd4   : > { %p1972_p2 = pneg %p1971_p10  ;;  %p1978_p12 = por %p1977_p9, %p1976_p13 }
  0xd6   : > { %p1979_p3 = pnand %p1978_p12, %p1972_p2 }
  0xd8   : > { %1982 = shalt.err (!%p1979_p3)
}
  0xd9   : > { %p2680_p5 = scmp.ne.s32.totalorder %s2672_s28, 0  ;;  %p2681_p6 = scmp.ne.s32.totalorder %s2662_s29, 0 }
  0xda   : > { %s2432_s26 = sand.u32 (!%p2681_p6), 1, %s2057_s22   ;;  %p2682_p1 = scmp.ne.s32.totalorder (!%p2681_p6), %s2659_s27, 0 }
  0xdb   : > { %1697 = dma.hbm_to_vmem [thread:$0]  (!%p2680_p5), %s2406_s8, 64, %s469_s10, %s458_s18  }
  0xdc   : > { %477 = sbr.rel (%p2681_p6) target bundleno = 1702 (0x6a6), region = 68  ;;  %s2435_s11 = sshll.u32 (!%p2681_p6), %s2432_s26, 3 }
  0xdd   : > { %s480_s19 = scalar_lea.sflag (!%p2681_p6), [#allocation4], %s2432_s26  ;;  %s483_s21 = scalar_lea.vmem (!%p2681_p6), [#allocation3], %s2435_s11 }
  0xe3   : > { %2028 = dma.done.wait (%p2682_p1), %s480_s19, 128  }
  0xe4   : > { %2030 = vsyncadd (%p2682_p1), %s480_s19, 4294967168  ;;  %s488_s29 = sand.u32 1, %s2171_s25   ;;  %s492_s8 = scalar_lea.vmem [#allocation6], %s2435_s11 }
  0xe5   : > { %s489_s28 = scalar_lea.sflag [#allocation7], %s488_s29 }
  0xe6   : > { %2032 = dma.done.wait (%p2682_p1), %s489_s28, 256  }
  0xe7   : > { %2034 = vsyncadd (%p2682_p1), %s489_s28, 4294967040  ;;  %s1512_s10 = sshll.u32 %s2432_s26, 2  ;;  %s501_s14 = scalar_lea.vmem [#allocation8], %s2435_s11 }
  0xe8   : > { %s507_s18 = scalar_lea.sflag [#allocation10], %s488_s29  ;;  %s2451_s16 = scalar_lea.vmem [#allocation9], %s1512_s10 }
  0xe9   : > { %2036 = dma.done.wait (%p2682_p1), %s507_s18, 64  }
  0xea   : > { %2038 = vsyncadd (%p2682_p1), %s507_s18, 4294967232  ;;  %p2683_p12 = scmp.eq.s32.totalorder %s2171_s25, 0 }
  0xec   : > { %2040 = dma.done.wait (%p2683_p12), [#allocation10], 256   ;;  %p2684_p4 = pmov %p2683_p12 }
  0xee   : > { %2042 = vsyncadd (%p2684_p4), [#allocation10], 4294967040  ;;  %p2685_p0 = pmov %p2684_p4 }
  0xf0   : > { %2044 = dma.done.wait (%p2685_p0), [#allocation13], 272   ;;  %p2686_p8 = pmov %p2685_p0 }
  0xf1   : > { %v2076_v0 = vmov 0.0   ;;  %vm2077_vm0 = vmmov 0   ;;  %v1755_v1 = vld [vmem:[%s2625_s6] sm:$0xff]   ;;  %v1757_v3 = vld [vmem:[%s2625_s6 + $0x8] sm:$0xff]   ;;  %vm608_vm1 = vcmask 261120   ;;  %vm789_vm2 = vcmask 64512  }
  0xf2   : > { %2046 = vsyncadd (%p2686_p8), [#allocation13], 4294967024  ;;  %1581 = vmatprep.subr.bf16.mxu1 %v2076_v0  ;;  %1573 = vmatprep.subr.bf16.mxu0 %v2076_v0  ;;  %v1756_v2 = vld [vmem:[#allocation11] sm:$0xff]   ;;  %v1758_v5 = vld [vmem:[#allocation11 + $0x8] sm:$0xff]   ;;  %s2078_s17 = smov 112   ;;  %s2079_s23 = smov 120  }
  0xf3   : > { %1585 = vmatprep.mubr.msk.bf16.mxu1 %vm2077_vm0, %v2076_v0  ;;  %1577 = vmatprep.mubr.msk.bf16.mxu0 %vm2077_vm0, %v2076_v0  ;;  %v581_v4 = vld [vmem:[%s492_s8] sm:$0xff]  ;;  %v579_v6 = vld [vmem:[%s483_s21] sm:$0xff]  ;;  %s2080_s19 = smov 104   ;;  %vm851_vm3 = vcmask 1043456   ;;  %s2081_s21 = smov 8   ;;  %vm1013_vm4 = vcmask 130112  }
  0xf4   : > { %1582 = vmatpush3.bf16.msra.mxu1 %v1755_v1  ;;  %1574 = vmatpush3.bf16.msra.mxu0 %v1756_v2  ;;  %v582_v7 = vpack.c.bf16 %v581_v4, %v581_v4  ;;  %v580_v8 = vpack.c.bf16 %v579_v6, %v579_v6  ;;  %v1521_v9 = vld [vmem:[%s2626_s7] ss:$0 sm:$0xff]  ;;  %v1759_v24 = vld [vmem:[#allocation12] sm:$0xff]   ;;  %v1760_v25 = vld [vmem:[#allocation12 + $0x8] sm:$0xff]   ;;  %s2687_s8 = sld [smem:[#allocation31_spill]]  ;;  %s2082_s18 = smov 16  }
  0xf5   : > { %1583 = vmatprep.subr.bf16.mxu1 %v2076_v0  ;;  %1575 = vmatprep.subr.bf16.mxu0 %v2076_v0  ;;  %v1517_v10 = vld [vmem:[%s2624_s5] ss:$0 sm:$0xff]  ;;  %v583_v26 = vld [vmem:[%s501_s14] sm:$0xff]  ;;  %v787_v37 = vld [vmem:[%s2451_s16] sm:$0xf]  ;;  %s2083_s16 = smov 24  }
  0xf6   : > { %v584_v27 = vpack.c.bf16 %v583_v26, %v583_v26  ;;  %v788_v38 = vunpack.c.l.bf16 %v787_v37  ;;  %v1525_v45 = vld [vmem:[#allocation14] ss:$0 sm:$0xff]  ;;  %vm1129_vm5 = vcmask 195712   ;;  %vm1245_vm6 = vcmask 261312   ;;  %s2688_s12 = sld [smem:[#allocation32_spill]]  ;;  %s2689_s1 = sld [smem:[#allocation26_spill]] }
  0xf7   : > { %s1542_s30 = sshll.u32 %s2171_s25, 7  ;;  %s577_s15 = scalar_lea.vmem [#allocation15], %s2435_s11 }
  0xf8   : > { %1584 = vmatpush3.bf16.msra.mxu1 %v1757_v3  ;;  %1576 = vmatpush3.bf16.msra.mxu0 %v1758_v5  ;;  %s1330_s20 = sshll.u32 %s577_s15, 4  ;;  %s1317_s25 = scalar_lea.sflag [#allocation5], %s2432_s26  ;;  %s2576_s20 = int_to_ptr.vmem [resolvable:$true] %s1330_s20 }
  0xf9   : > { %1597 = vmatprep.subr.bf16.mxu1 %v2076_v0  ;;  %1589 = vmatprep.subr.bf16.mxu0 %v2076_v0  ;;  %s1983_s11 = scalar_lea.vmem %s2576_s20, 128  ;;  %s2084_s29 = smov [#allocation15]  }
  0xfa   : > { %p1984_p7 = scmp.ne.s32.totalorder %s2576_s20, %s1983_s11  ;;  %s1987_s28 = sshll.u32 %s2084_s29, 4  ;;  %s1988_s28 = int_to_ptr.vmem [resolvable:$false] %s1987_s28 }
  0xfb   : > { %1586 = vmatmul.mubr.msk.bf16.vlgmr.msra.gmra.mrb[0].mxu1 %vm608_vm1, %v582_v7  ;;  %1578 = vmatmul.mubr.msk.bf16.vlgmr.msra.gmra.mrb[0].mxu0 %vm608_vm1, %v580_v8  ;;  %s1989_s10 = scalar_lea.vmem %s1988_s28, 256  ;;  %p1990_p13 = scmp.lt.s32.totalorder %s2576_s20, %s1988_s28 }
  0xfc   : > { %1599 = vmatprep.mubr.msk.bf16.mxu1 %vm2077_vm0, %v2076_v0  ;;  %1593 = vmatprep.mubr.msk.bf16.mxu0 %vm2077_vm0, %v2076_v0  ;;  %p2692_p11 = scmp.ne.s32.totalorder %s2689_s1, 0  ;;  %p1991_p9 = scmp.lt.s32.totalorder %s1989_s10, %s1983_s11 }
  0xfd   : > { %1590 = vmatpush3.bf16.msra.mxu0 %v1759_v24 }
  0xfe   : > { %1591 = vmatprep.subr.bf16.mxu0 %v2076_v0  ;;  %p1985_p10 = pnand %p1984_p7, %p2692_p11  ;;  %p1992_p3 = por %p1991_p9, %p1990_p13 }
 0x100   : > { %p1986_p2 = pneg %p1985_p10 }
 0x101   : > { %1592 = vmatpush3.bf16.msra.mxu0 %v1760_v25 }
 0x102   : > { %1603 = vmatprep.subr.bf16.mxu0 %v2076_v0  ;;  %p1993_p5 = pnand %p1992_p3, %p1986_p2 }
 0x104   : > { %1594 = vmatmul.mubr.msk.bf16.vlgmr.msra.gmra.mrb[4].mxu0 %vm608_vm1, %v584_v27 }
 0x105   : > { %1605 = vmatprep.mubr.msk.bf16.mxu0 %vm2077_vm0, %v2076_v0 }
 0x1ce   : > { %v712_v11 = vpop.f32.mrb[0].mxu1  ;;  %v646_v14 = vpop.f32.mrb[0].mxu0 }
 0x1cf   : > { %v713_v12 = vadd.f32 %v1521_v9, %v712_v11  ;;  %v1587_v13 = vpop.f32.mrb[1].mxu1  ;;  %v647_v16 = vadd.f32 %v1517_v10, %v646_v14  ;;  %v1579_v17 = vpop.f32.mrb[1].mxu0 }
 0x1d0   : > { %v715_v15 = vpop.f32.mrb[2].mxu1  ;;  %v649_v20 = vpop.f32.mrb[2].mxu0 }
 0x1d1   : > { %v785_v18 = vpack.c.bf16 %v713_v12, %v713_v12  ;;  %v1588_v19 = vpop.f32.mrb[3].mxu1  ;;  %v1580_v21 = vpop.f32.mrb[3].mxu0  ;;  %v784_v22 = vpack.c.bf16 %v647_v16, %v647_v16 }
 0x1d3   : > { %1017 = vrot.lane.b32.xlu1 %v785_v18, %s2078_s17  ;;  %900 = vrot.lane.b32.xlu0 %v785_v18, %s2079_s23  ;;  %v794_v23 = vsel %vm789_vm2, %v785_v18, 0 }
 0x1d4   : > { %1598 = vmatpush3.bf16.xpose.msra.mxu1 %v794_v23 }
 0x1d5   : > { %1609 = vmatprep.subr.bf16.mxu1 %v2076_v0 }
 0x1d7   : > { %1015 = vrot.lane.b32.xlu1 %v784_v22, %s2078_s17  ;;  %897 = vrot.lane.b32.xlu0 %v784_v22, %s2079_s23  ;;  %v778_v46 = vpop.f32.mrb[4].mxu0 }
 0x1d8   : > { %v779_v47 = vadd.f32 %v1525_v45, %v778_v46  ;;  %v1595_v48 = vpop.f32.mrb[5].mxu0 }
 0x1d9   : > { %v781_v49 = vpop.f32.mrb[6].mxu0 }
 0x1da   : > { %v786_v50 = vpack.c.bf16 %v779_v47, %v779_v47  ;;  %v1596_v51 = vpop.f32.mrb[7].mxu0 }
 0x1db   : > { %1131 = vrot.lane.b32.xlu1 %v784_v22, %s2080_s19  ;;  %1133 = vrot.lane.b32.xlu0 %v785_v18, %s2080_s19 }
 0x1dc   : > { %1600 = vmatmul.mubr.msk.bf16.vlgmr.msra.gmra.mrb[4].mxu1 %vm789_vm2, %v784_v22  ;;  %v853_v52 = vsel %vm851_vm3, %v786_v50, 0 }
 0x1dd   : > { %1611 = vmatprep.mubr.msk.bf16.mxu1 %vm2077_vm0, %v2076_v0  ;;  %1604 = vmatpush3.bf16.msra.mxu0 %v853_v52 }
 0x1de   : > { %1615 = vmatprep.subr.bf16.mxu0 %v2076_v0 }
 0x245   : > { %v901_v28 = vpop.permute.xlu0 %900  ;;  %v1018_v30 = vpop.permute.xlu1 %1017 }
 0x246   : > { %v906_v29 = vsel %vm789_vm2, %v901_v28, 0  ;;  %v1023_v32 = vsel %vm789_vm2, %v1018_v30, 0 }
 0x247   : > { %1610 = vmatpush3.bf16.xpose.msra.mxu1 %v906_v29 }
 0x248   : > { %1621 = vmatprep.subr.bf16.mxu1 %v2076_v0 }
 0x249   : > { %v898_v31 = vpop.permute.xlu0 %897  ;;  %v1016_v34 = vpop.permute.xlu1 %1015 }
 0x24d   : > { %v1134_v33 = vpop.permute.xlu0 %1133  ;;  %v1132_v36 = vpop.permute.xlu1 %1131 }
 0x24e   : > { %1612 = vmatmul.mubr.msk.bf16.vlgmr.msra.gmra.mrb[8].mxu1 %vm789_vm2, %v898_v31  ;;  %v1139_v35 = vsel %vm789_vm2, %v1134_v33, 0 }
 0x24f   : > { %1622 = vmatpush3.bf16.xpose.msra.mxu1 %v1023_v32  ;;  %1623 = vmatprep.mubr.msk.bf16.mxu1 %vm2077_vm0, %v2076_v0 }
 0x250   : > { %1633 = vmatprep.subr.bf16.mxu1 %v2076_v0 }
 0x256   : > { %1624 = vmatmul.mubr.msk.bf16.vlgmr.msra.gmra.mrb[12].mxu1 %vm789_vm2, %v1016_v34 }
 0x257   : > { %1634 = vmatpush3.bf16.xpose.msra.mxu1 %v1139_v35  ;;  %1635 = vmatprep.mubr.msk.bf16.mxu1 %vm2077_vm0, %v2076_v0 }
 0x258   : > { %1645 = vmatprep.subr.bf16.mxu1 %v2076_v0 }
 0x25e   : > { %1636 = vmatmul.mubr.msk.bf16.vlgmr.msra.gmra.mrb[16].mxu1 %vm789_vm2, %v1132_v36 }
 0x25f   : > { %1649 = vmatprep.mubr.msk.bf16.mxu1 %vm2077_vm0, %v2076_v0 }
 0x2af   : > { %v830_v39 = vpop.f32.mrb[4].mxu1 }
 0x2b0   : > { %v831_v40 = vadd.f32 %v830_v39, %v788_v38  ;;  %v1601_v41 = vpop.f32.mrb[5].mxu1 }
 0x2b1   : > { %v833_v42 = vpop.f32.mrb[6].mxu1 }
 0x2b2   : > { %v1602_v43 = vpop.f32.mrb[7].mxu1  ;;  %v836_v44 = vsel %vm789_vm2, %v831_v40, -inf }
 0x2b3   : > { %837 = vmax.xlane.f32.xlu0 %v836_v44 }
 0x321   : > { %v942_v53 = vpop.f32.mrb[8].mxu1 }
 0x322   : > { %v943_v54 = vadd.f32 %v942_v53, %v788_v38  ;;  %v1613_v55 = vpop.f32.mrb[9].mxu1 }
 0x323   : > { %v945_v56 = vpop.f32.mrb[10].mxu1 }
 0x324   : > { %v1614_v57 = vpop.f32.mrb[11].mxu1  ;;  %v948_v58 = vsel %vm789_vm2, %v943_v54, -inf }
 0x325   : > { %949 = vmax.xlane.f32.xlu1 %v948_v58  ;;  %v1761_v58 = vld [vmem:[%s2687_s8] sm:$0xff]  }
 0x326   : > { %1646 = vmatpush3.bf16.msra.mxu1 %v1761_v58 }
 0x327   : > { %1647 = vmatprep.subr.bf16.mxu1 %v2076_v0 }
 0x329   : > { %v1059_v59 = vpop.f32.mrb[12].mxu1 }
 0x32a   : > { %v1060_v60 = vadd.f32 %v1059_v59, %v788_v38  ;;  %v1625_v61 = vpop.f32.mrb[13].mxu1  ;;  %v1762_v59 = vld [vmem:[%s2687_s8 + $0x8] sm:$0xff]  }
 0x32b   : > { %v1062_v62 = vpop.f32.mrb[14].mxu1  ;;  %1648 = vmatpush3.bf16.msra.mxu1 %v1762_v59 }
 0x32c   : > { %v1626_v63 = vpop.f32.mrb[15].mxu1  ;;  %v1065_v1 = vsel %vm789_vm2, %v1060_v60, -inf }
 0x32d   : > { %1066 = vmax.xlane.f32.xlu0 %v1065_v1 }
 0x331   : > { %v1175_v2 = vpop.f32.mrb[16].mxu1 }
 0x332   : > { %v1176_v3 = vadd.f32 %v1175_v2, %v788_v38  ;;  %v1637_v4 = vpop.f32.mrb[17].mxu1 }
 0x333   : > { %v1178_v5 = vpop.f32.mrb[18].mxu1 }
 0x334   : > { %v1638_v6 = vpop.f32.mrb[19].mxu1  ;;  %v1181_v7 = vsel %vm789_vm2, %v1176_v3, -inf }
 0x335   : > { %1182 = vmax.xlane.f32.xlu0 %v1181_v7 }
 0x340   : > { %v838_v8 = vpop.xlane.xlu0 %837 }
 0x341   : > { %v839_v9 = vsub.f32 %v831_v40, %v838_v8 }
 0x343   : > { %v840_v10 = vmul.f32 1.442695, %v839_v9  ;;  %v1537_v9 = vld [vmem:[%s2688_s12] ss:$0 sm:$0xff] }
 0x345   : > { %1763 = vpow2.f32 %v840_v10 }
 0x34f   : > { %v1764_v11 = vpop.eup %1763 }
 0x350   : > { %v842_v12 = vsel %vm789_vm2, %v1764_v11, 0.0 }
 0x351   : > { %843 = vadd.xlane.f32.xlu1 %v842_v12 }
 0x362   : > { %961 = vrot.lane.b32.xlu1 %v786_v50, %s2079_s23  ;;  %s2690_s23 = sld [smem:[#allocation33_spill]] }
 0x3b2   : > { %v950_v13 = vpop.xlane.xlu1 %949 }
 0x3b3   : > { %v951_v14 = vsub.f32 %v943_v54, %v950_v13 }
 0x3b5   : > { %v952_v15 = vmul.f32 1.442695, %v951_v14 }
 0x3b7   : > { %1765 = vpow2.f32 %v952_v15 }
 0x3ba   : > { %v1067_v16 = vpop.xlane.xlu0 %1066 }
 0x3bb   : > { %v1068_v17 = vsub.f32 %v1060_v60, %v1067_v16 }
 0x3bd   : > { %v1069_v18 = vmul.f32 1.442695, %v1068_v17 }
 0x3bf   : > { %1767 = vpow2.f32 %v1069_v18 }
 0x3c1   : > { %v1766_v19 = vpop.eup %1765 }
 0x3c2   : > { %v1183_v20 = vpop.xlane.xlu0 %1182  ;;  %v954_v21 = vsel %vm789_vm2, %v1766_v19, 0.0 }
 0x3c3   : > { %v1184_v22 = vsub.f32 %v1176_v3, %v1183_v20  ;;  %955 = vadd.xlane.f32.xlu0 %v954_v21 }
 0x3c5   : > { %v1185_v23 = vmul.f32 1.442695, %v1184_v22 }
 0x3c7   : > { %1769 = vpow2.f32 %v1185_v23 }
 0x3c9   : > { %v1768_v24 = vpop.eup %1767 }
 0x3ca   : > { %v1071_v25 = vsel %vm789_vm2, %v1768_v24, 0.0 }
 0x3cb   : > { %1072 = vadd.xlane.f32.xlu1 %v1071_v25 }
 0x3d1   : > { %v1770_v26 = vpop.eup %1769 }
 0x3d2   : > { %v1187_v27 = vsel %vm789_vm2, %v1770_v26, 0.0 }
 0x3d3   : > { %1188 = vadd.xlane.f32.xlu0 %v1187_v27 }
 0x3dc   : > { %1193 = vrot.lane.b32.xlu1 %v786_v50, %s2080_s19  ;;  %s2691_s19 = smov %s2690_s23 }
 0x3de   : > { %v844_v28 = vpop.xlane.xlu1 %843 }
 0x3df   : > { %1771 = vrcp.f32 %v844_v28 }
 0x3e2   : > { %v962_v30 = vpop.permute.xlu1 %961 }
 0x3e3   : > { %v967_v33 = vsel %vm851_vm3, %v962_v30, 0 }
 0x3e9   : > { %v1772_v29 = vpop.eup %1771  ;;  %1077 = vrot.lane.b32.xlu0 %v786_v50, %s2078_s17 }
 0x3ea   : > { %v846_v31 = vmul.f32 %v1772_v29, %v1764_v11 }
 0x3ec   : > { %v847_v32 = vpack.c.bf16 %v846_v31, %v846_v31 }
 0x3ee   : > { %1606 = vmatmul.mubr.msk.bf16.vlgmr.msra.gmra.mrb[8].mxu0 %vm789_vm2, %v847_v32 }
 0x3ef   : > { %1616 = vmatpush3.bf16.msra.mxu0 %v967_v33  ;;  %1617 = vmatprep.mubr.msk.bf16.mxu0 %vm2077_vm0, %v2076_v0 }
 0x3f0   : > { %1627 = vmatprep.subr.bf16.mxu0 %v2076_v0 }
 0x450   : > { %v956_v34 = vpop.xlane.xlu0 %955 }
 0x451   : > { %1773 = vrcp.f32 %v956_v34 }
 0x458   : > { %v1073_v35 = vpop.xlane.xlu1 %1072 }
 0x459   : > { %1775 = vrcp.f32 %v1073_v35 }
 0x45b   : > { %v1774_v36 = vpop.eup %1773 }
 0x45c   : > { %v958_v37 = vmul.f32 %v1774_v36, %v1766_v19  ;;  %v1194_v44 = vpop.permute.xlu1 %1193 }
 0x45d   : > { %v1199_v46 = vsel %vm851_vm3, %v1194_v44, 0 }
 0x45e   : > { %v959_v38 = vpack.c.bf16 %v958_v37, %v958_v37 }
 0x460   : > { %v1189_v39 = vpop.xlane.xlu0 %1188  ;;  %1618 = vmatmul.mubr.msk.bf16.vlgmr.msra.gmra.mrb[12].mxu0 %vm789_vm2, %v959_v38 }
 0x461   : > { %1777 = vrcp.f32 %v1189_v39  ;;  %1629 = vmatprep.mubr.msk.bf16.mxu0 %vm2077_vm0, %v2076_v0 }
 0x463   : > { %v1776_v40 = vpop.eup %1775 }
 0x464   : > { %v1075_v41 = vmul.f32 %v1776_v40, %v1768_v24  ;;  %v1078_v42 = vpop.permute.xlu0 %1077 }
 0x465   : > { %v1083_v43 = vsel %vm851_vm3, %v1078_v42, 0 }
 0x466   : > { %1628 = vmatpush3.bf16.msra.mxu0 %v1083_v43  ;;  %v1076_v45 = vpack.c.bf16 %v1075_v41, %v1075_v41 }
 0x467   : > { %1639 = vmatprep.subr.bf16.mxu0 %v2076_v0 }
 0x469   : > { %1630 = vmatmul.mubr.msk.bf16.vlgmr.msra.gmra.mrb[16].mxu0 %vm789_vm2, %v1076_v45 }
 0x46a   : > { %1640 = vmatpush3.bf16.msra.mxu0 %v1199_v46  ;;  %1641 = vmatprep.mubr.msk.bf16.mxu0 %vm2077_vm0, %v2076_v0 }
 0x46b   : > { %v1778_v47 = vpop.eup %1777 }
 0x46c   : > { %v1191_v48 = vmul.f32 %v1778_v47, %v1770_v26 }
 0x46e   : > { %v1192_v49 = vpack.c.bf16 %v1191_v48, %v1191_v48 }
 0x471   : > { %1642 = vmatmul.mubr.msk.bf16.vlgmr.msra.gmra.mrb[20].mxu0 %vm789_vm2, %v1192_v49 }
 0x4c1   : > { %v889_v50 = vpop.f32.mrb[8].mxu0 }
 0x4c2   : > { %895 = vst.msk [vmem:[#allocation2] sm:$0xff] %vm789_vm2, %v889_v50  ;;  %v1607_v51 = vpop.f32.mrb[9].mxu0 }
 0x4c3   : > { %v892_v52 = vpop.f32.mrb[10].mxu0 }
 0x4c4   : > { %v1608_v53 = vpop.f32.mrb[11].mxu0 }
 0x533   : > { %v1003_v54 = vpop.f32.mrb[12].mxu0 }
 0x534   : > { %1010 = vrot.lane.b32.xlu1 %v1003_v54, %s2081_s21  ;;  %v1619_v55 = vpop.f32.mrb[13].mxu0  ;;  %s2574_s21 = scalar_lea.hbm %s2690_s23, %s1542_s30 }
 0x535   : > { %v1006_v56 = vpop.f32.mrb[14].mxu0 }
 0x536   : > { %v1620_v57 = vpop.f32.mrb[15].mxu0 }
 0x53c   : > { %v1119_v60 = vpop.f32.mrb[16].mxu0 }
 0x53d   : > { %1126 = vrot.lane.b32.xlu0 %v1119_v60, %s2082_s18  ;;  %v1631_v61 = vpop.f32.mrb[17].mxu0 }
 0x53e   : > { %v1122_v62 = vpop.f32.mrb[18].mxu0 }
 0x53f   : > { %v1632_v63 = vpop.f32.mrb[19].mxu0 }
 0x544   : > { %v1235_v1 = vpop.f32.mrb[20].mxu0 }
 0x545   : > { %1242 = vrot.lane.b32.xlu1 %v1235_v1, %s2083_s16  ;;  %v1643_v2 = vpop.f32.mrb[21].mxu0 }
 0x546   : > { %v1238_v3 = vpop.f32.mrb[22].mxu0 }
 0x547   : > { %v1644_v4 = vpop.f32.mrb[23].mxu0 }
 0x5a6   : > { %v1011_v5 = vpop.permute.xlu1 %1010 }
 0x5a7   : > { %1014 = vst.msk [vmem:[#allocation2] sm:$0xff] %vm1013_vm4, %v1011_v5 }
 0x5af   : > { %v1127_v0 = vpop.permute.xlu0 %1126 }
 0x5b0   : > { %1130 = vst.msk [vmem:[#allocation2] sm:$0xff] %vm1129_vm5, %v1127_v0 }
 0x5b7   : > { %v1243_v6 = vpop.permute.xlu1 %1242 }
 0x5b8   : > { %1246 = vst.msk [vmem:[#allocation2] sm:$0xff] %vm1245_vm6, %v1243_v6 }
 0x5bf   : > { %v1247_v7 = vld [vmem:[#allocation2] sm:$0xff] }
 0x5c0   : > { %v1248_v8 = vpack.c.bf16 %v1247_v7, %v1247_v7 }
 0x5c2   : > { %1650 = vmatmul.mubr.msk.bf16.vlgmr.msra.gmra.mrb[20].mxu1 %vm608_vm1, %v1248_v8 }
 0x695   : > { %v1309_v10 = vpop.f32.mrb[20].mxu1 }
 0x696   : > { %v1310_v11 = vadd.f32 %v1537_v9, %v1309_v10  ;;  %v1651_v12 = vpop.f32.mrb[21].mxu1 }
 0x697   : > { %v1312_v13 = vpop.f32.mrb[22].mxu1 }
 0x698   : > { %v1652_v14 = vpop.f32.mrb[23].mxu1  ;;  %1315 = vst.msk [vmem:[%s577_s15] sm:$0xff] %vm608_vm1, %v1310_v11 }
 0x699   : > { %1996 = shalt.err (!%p1993_p5)
}
 0x69a   : > { %s1997_s26 = scalar_lea.hbm %s2574_s21, 128  ;;  %s2001_s16 = scalar_lea.hbm %s2691_s19, 256 }
 0x69b   : > { %p1998_p6 = scmp.ne.s32.totalorder %s2574_s21, %s1997_s26  ;;  %p2002_p4 = scmp.lt.u32.totalorder %s2574_s21, %s2691_s19 }
 0x69c   : > { %p2003_p0 = scmp.lt.u32.totalorder %s2001_s16, %s1997_s26  ;;  %p2005_p7 = scmp.lt.u32.totalorder %s1997_s26, %s2574_s21 }
 0x69d   : > { %p1999_p1 = pnand %p1998_p6, %p2692_p11 }
 0x69e   : > { %p2004_p8 = por %p2003_p0, %p2002_p4 }
 0x69f   : > { %p2000_p12 = pneg %p1999_p1 }
 0x6a0   : > { %p2006_p10 = por %p2005_p7, %p2004_p8 }
 0x6a2   : > { %p2007_p2 = pnand %p2006_p10, %p2000_p12 }
 0x6a4   : > { %2010 = shalt.err (!%p2007_p2)
}
 0x6a5   : > { %1673 = dma.vmem_to_hbm [thread:$0]  (%p2692_p11), %s2576_s20, 128, %s2574_s21, %s1317_s25  }
 0x6a6 PF: > { %s2693_s12 = sld [smem:[#allocation22_spill]]  ;;  %s2694_s30 = sld [smem:[#allocation24_spill]] }
 0x6a7   : > { %p2696_p9 = scmp.ge.s32.totalorder %s2065_s24, 2 }
 0x6ac   : > { %s1342_s15 = sand.u32 1, %s2693_s12   ;;  %p2695_p13 = scmp.ne.s32.totalorder %s2694_s30, 0 }
 0x6ad   : > { %s1343_s13 = scalar_lea.sflag [#allocation5], %s1342_s15 }
 0x6ae   : > { %p1699_p3 = pnand %p2696_p9, %p2695_p13 }
 0x6b0   : > { %2048 = dma.done.wait (!%p1699_p3), %s1343_s13, 128  }
 0x6b1   : > { %2050 = vsyncadd (!%p1699_p3), %s1343_s13, 4294967168  ;;  %s2697_s24 = sld [smem:[#allocation25_spill]]  ;;  %s2698_s17 = sld [smem:[#allocation23_spill]] }
 0x6b2   : > { %s2699_s23 = sld [smem:[#allocation27_spill]]  ;;  %s2700_s21 = smov %s2057_s22 }
 0x6b7   : > { %p32_p5 = scmp.ge.s32.totalorder %s2697_s24, 4   ;;  %s2701_s22 = smov %s2698_s17 }
 0x6b9   :  { %34 = sbr.rel (!%p32_p5) target bundleno = 17 (0x11), region = 162 }
 0x6c0   :  { %1348 = vsyncpa [#allocation4], 1 }
 0x6c1   :  { %1350 = vsyncpa [#allocation4 + $0x1], 1 }
 0x6c2   :  { %1351 = vsyncpa [#allocation7], 1 }
 0x6c3   :  { %1353 = vsyncpa [#allocation7 + $0x1], 1 }
 0x6c4   :  { %1354 = vsyncpa [#allocation10], 1 }
 0x6c5   :  { %1356 = vsyncpa [#allocation10 + $0x1], 1 }
 0x6c6   :  { %1357 = vsyncpa [#allocation13], 1 }
 0x6c7   :  { %1358 = vsyncpa [#allocation5], 1 }
 0x6c8   :  { %1360 = vsyncpa [#allocation5 + $0x1], 1 }

</bundles_post_ra>
